<compile_context>
chip_gen: v6e
topology: v6e:2x2x1
jax: 0.10.0
libtpu: 0.0.40
codegen_flags: <defaults>
</compile_context>

<pallas_src>
import functools

import jax
import jax.numpy as jnp
from jax import lax
from jax.experimental import pallas as pl
from jax.experimental.pallas import tpu as pltpu


def _round_up(x, m):
    return (x + m - 1) // m * m


def _fasttext_kernel(seq_len, out_dim, ids_ref, table_ref, w_ref, bias_ref, o_ref):
    # ids_ref  : (b_tile, S)      int32  VMEM   (token ids for this batch tile)
    # table_ref: (V_pad, D_pad)   f32    VMEM   (resident: constant block index)
    # w_ref    : (D_pad, O_pad)   f32    VMEM   (fc weight, transposed)
    # bias_ref : (1, O_pad)       f32    VMEM
    # o_ref    : (b_tile, O_pad)  f32    VMEM
    b_tile = ids_ref.shape[0]
    v_pad = table_ref.shape[0]

    ids = ids_ref[...]                                              # (b_tile, S)

    # --- Bag-of-words counts: counts[b, v] = #times token v appears in row b.
    # Static, short seq loop (unrolled); each step is one lane-broadcast compare
    # + add over a lane-dense (b_tile, V_pad) tile on the VPU.
    vocab_iota = lax.broadcasted_iota(jnp.int32, (b_tile, v_pad), 1)
    counts = jnp.zeros((b_tile, v_pad), jnp.float32)
    for s in range(seq_len):
        tok = ids[:, s:s + 1]                                       # (b_tile, 1)
        counts = counts + (vocab_iota == tok).astype(jnp.float32)

    # --- Fused gather + mean-pool as one MXU matmul: (b_tile,V_pad)x(V_pad,D_pad).
    pooled = jnp.dot(counts, table_ref[...],
                     preferred_element_type=jnp.float32)            # (b_tile, D_pad)
    pooled = pooled * jnp.float32(1.0 / seq_len)

    # --- Linear layer on the MXU (K = D_pad, N = O_pad, both lane-dense).
    logits = jnp.dot(pooled, w_ref[...],
                     preferred_element_type=jnp.float32) + bias_ref[...]

    # --- Mask padded output columns so they do not contribute to the softmax.
    col = lax.broadcasted_iota(jnp.int32, logits.shape, 1)
    logits = jnp.where(col < out_dim, logits, jnp.float32(-1e30))

    # --- Numerically stable log-softmax over the (padded) output axis.
    m = jnp.max(logits, axis=-1, keepdims=True)
    shifted = logits - m
    lse = jnp.log(jnp.sum(jnp.exp(shifted), axis=-1, keepdims=True))
    o_ref[...] = (shifted - lse).astype(o_ref.dtype)


def fasttext_forward(x_tokens, embedding_table, fc_weight, fc_bias, *, b_tile=None):
    """x_tokens: (seq_len, batch) int32 token ids (PyTorch convention)."""
    seq_len, batch = x_tokens.shape
    vocab, emb_dim = embedding_table.shape
    out_dim = fc_weight.shape[0]

    d_pad = _round_up(emb_dim, 128)       # lane dim of pooled / K of fc matmul
    o_pad = _round_up(out_dim, 128)       # lane dim of logits / output
    v_pad = _round_up(vocab, 128)         # lane dim of counts / K of pooling matmul

    # Sublane-aligned batch tile: up to 128 rows per grid step (MXU-dense),
    # smaller for tiny batches so we do not pad the batch 16x.
    if b_tile is None:
        b_tile = min(128, _round_up(batch, 8))
    b_pad = _round_up(batch, b_tile)

    # Token ids -> (B_pad, S) int32 (padded rows use token 0; sliced off below).
    ids = jnp.transpose(x_tokens.astype(jnp.int32), (1, 0))
    ids = jnp.pad(ids, ((0, b_pad - batch), (0, 0)))

    # Zero-pad table / fc params to lane-dense shapes (zeros are exact no-ops
    # in both matmuls; padded logit columns are masked in-kernel).
    table_pad = jnp.pad(embedding_table.astype(jnp.float32),
                        ((0, v_pad - vocab), (0, d_pad - emb_dim)))   # (V_pad, D_pad)
    w_pad = jnp.pad(fc_weight.astype(jnp.float32).T,
                    ((0, d_pad - emb_dim), (0, o_pad - out_dim)))     # (D_pad, O_pad)
    bias_pad = jnp.pad(fc_bias.astype(jnp.float32),
                       (0, o_pad - out_dim)).reshape(1, o_pad)        # (1, O_pad)

    kernel = functools.partial(_fasttext_kernel, seq_len, out_dim)

    # VMEM budget: resident table + weights + small double-buffered tiles.
    table_bytes = v_pad * d_pad * 4
    vmem_limit = int(min(100 << 20, max(32 << 20, 2 * table_bytes + (8 << 20))))

    out_pad = pl.pallas_call(
        kernel,
        out_shape=jax.ShapeDtypeStruct((b_pad, o_pad), jnp.float32),
        grid_spec=pltpu.PrefetchScalarGridSpec(
            num_scalar_prefetch=0,
            grid=(b_pad // b_tile,),
            in_specs=[
                pl.BlockSpec((b_tile, seq_len), lambda i: (i, 0)),    # ids tile
                pl.BlockSpec((v_pad, d_pad), lambda i: (0, 0)),       # table (resident)
                pl.BlockSpec((d_pad, o_pad), lambda i: (0, 0)),       # W^T
                pl.BlockSpec((1, o_pad), lambda i: (0, 0)),           # bias
            ],
            out_specs=pl.BlockSpec((b_tile, o_pad), lambda i: (i, 0)),
        ),
        compiler_params=pltpu.CompilerParams(
            dimension_semantics=("parallel",),
            vmem_limit_bytes=vmem_limit,
        ),
    )(ids, table_pad, w_pad, bias_pad)

    return out_pad[:batch, :out_dim]


def reference_forward(x_tokens, embedding_table, fc_weight, fc_bias):
    """Pure-JAX reference matching the PyTorch module."""
    embedded = jnp.take(embedding_table, x_tokens, axis=0)            # (S, B, D)
    embedded = jnp.transpose(embedded, (1, 0, 2))                     # (B, S, D)
    pooled = jnp.mean(embedded, axis=1)                               # (B, D)
    logits = pooled @ fc_weight.T + fc_bias                           # (B, O)
    return jax.nn.log_softmax(logits, axis=-1)


if __name__ == "__main__":
    # Small, deterministic setup.
    vocab_size = 50
    embedding_dim = 32
    output_dim = 8
    seq_len = 8
    batch = 4

    key = jax.random.PRNGKey(0)
    k_emb, k_w, k_b, k_x = jax.random.split(key, 4)

    embedding_table = jax.random.normal(
        k_emb, (vocab_size, embedding_dim), dtype=jnp.float32)
    fc_weight = jax.random.normal(
        k_w, (output_dim, embedding_dim), dtype=jnp.float32) * 0.1
    fc_bias = jax.random.normal(k_b, (output_dim,), dtype=jnp.float32) * 0.1

    # PyTorch-style input: (seq_len, batch) token indices.
    x = jax.random.randint(k_x, (seq_len, batch), 0, vocab_size, dtype=jnp.int32)

    out = fasttext_forward(x, embedding_table, fc_weight, fc_bias)
    out = jax.block_until_ready(out)

    ref = reference_forward(x, embedding_table, fc_weight, fc_bias)
    assert out.shape == (batch, output_dim)
    err = jnp.max(jnp.abs(out - ref))
    assert jnp.allclose(out, ref, atol=1e-5, rtol=1e-5), f"max abs err {err}"

    print("KERNEL_OK")
</pallas_src>

<mosaic_0001>
module attributes {stable_mosaic.version = 11 : i64} {
  func.func @_fasttext_kernel(%arg0: i32, %arg1: memref<8x8xi32, #tpu.memory_space<vmem>>, %arg2: memref<128x128xf32, #tpu.memory_space<vmem>>, %arg3: memref<128x128xf32, #tpu.memory_space<vmem>>, %arg4: memref<1x128xf32, #tpu.memory_space<vmem>>, %arg5: memref<8x128xf32, #tpu.memory_space<vmem>>) attributes {dimension_semantics = [#tpu.dimension_semantics<parallel>], iteration_bounds = array<i64: 1>, scalar_prefetch = 0 : i64, scratch_operands = 0 : i64, tpu.core_type = #tpu.core_type<tc>, window_params = [{transform_indices = @transform_0, window_bounds = array<i64: 8, 8>}, {pipeline_mode = #tpu.pipeline_mode<synchronous>, transform_indices = @transform_1, window_bounds = array<i64: 128, 128>}, {pipeline_mode = #tpu.pipeline_mode<synchronous>, transform_indices = @transform_2, window_bounds = array<i64: 128, 128>}, {pipeline_mode = #tpu.pipeline_mode<synchronous>, transform_indices = @transform_3, window_bounds = array<i64: 1, 128>}, {transform_indices = @transform_4, window_bounds = array<i64: 8, 128>}]} {
    %c0 = arith.constant 0 : index
    %c0_0 = arith.constant 0 : index
    %0 = vector.load %arg1[%c0, %c0_0] : memref<8x8xi32, #tpu.memory_space<vmem>>, vector<8x8xi32>
    %1 = tpu.iota {dimensions = array<i32: 1>} : vector<8x128xi32>
    %cst = arith.constant 0.000000e+00 : f32
    %2 = vector.broadcast %cst : f32 to vector<8x128xf32>
    %3 = vector.extract_strided_slice %0 {offsets = [0, 0], sizes = [8, 1], strides = [1, 1]} : vector<8x8xi32> to vector<8x1xi32>
    %4 = vector.broadcast %3 : vector<8x1xi32> to vector<8x128xi32>
    %5 = arith.cmpi eq, %1, %4 : vector<8x128xi32>
    %6 = arith.extui %5 : vector<8x128xi1> to vector<8x128xi32>
    %7 = arith.sitofp %6 : vector<8x128xi32> to vector<8x128xf32>
    %8 = arith.addf %2, %7 : vector<8x128xf32>
    %9 = vector.extract_strided_slice %0 {offsets = [0, 1], sizes = [8, 1], strides = [1, 1]} : vector<8x8xi32> to vector<8x1xi32>
    %10 = vector.broadcast %9 : vector<8x1xi32> to vector<8x128xi32>
    %11 = arith.cmpi eq, %1, %10 : vector<8x128xi32>
    %12 = arith.extui %11 : vector<8x128xi1> to vector<8x128xi32>
    %13 = arith.sitofp %12 : vector<8x128xi32> to vector<8x128xf32>
    %14 = arith.addf %8, %13 : vector<8x128xf32>
    %15 = vector.extract_strided_slice %0 {offsets = [0, 2], sizes = [8, 1], strides = [1, 1]} : vector<8x8xi32> to vector<8x1xi32>
    %16 = vector.broadcast %15 : vector<8x1xi32> to vector<8x128xi32>
    %17 = arith.cmpi eq, %1, %16 : vector<8x128xi32>
    %18 = arith.extui %17 : vector<8x128xi1> to vector<8x128xi32>
    %19 = arith.sitofp %18 : vector<8x128xi32> to vector<8x128xf32>
    %20 = arith.addf %14, %19 : vector<8x128xf32>
    %21 = vector.extract_strided_slice %0 {offsets = [0, 3], sizes = [8, 1], strides = [1, 1]} : vector<8x8xi32> to vector<8x1xi32>
    %22 = vector.broadcast %21 : vector<8x1xi32> to vector<8x128xi32>
    %23 = arith.cmpi eq, %1, %22 : vector<8x128xi32>
    %24 = arith.extui %23 : vector<8x128xi1> to vector<8x128xi32>
    %25 = arith.sitofp %24 : vector<8x128xi32> to vector<8x128xf32>
    %26 = arith.addf %20, %25 : vector<8x128xf32>
    %27 = vector.extract_strided_slice %0 {offsets = [0, 4], sizes = [8, 1], strides = [1, 1]} : vector<8x8xi32> to vector<8x1xi32>
    %28 = vector.broadcast %27 : vector<8x1xi32> to vector<8x128xi32>
    %29 = arith.cmpi eq, %1, %28 : vector<8x128xi32>
    %30 = arith.extui %29 : vector<8x128xi1> to vector<8x128xi32>
    %31 = arith.sitofp %30 : vector<8x128xi32> to vector<8x128xf32>
    %32 = arith.addf %26, %31 : vector<8x128xf32>
    %33 = vector.extract_strided_slice %0 {offsets = [0, 5], sizes = [8, 1], strides = [1, 1]} : vector<8x8xi32> to vector<8x1xi32>
    %34 = vector.broadcast %33 : vector<8x1xi32> to vector<8x128xi32>
    %35 = arith.cmpi eq, %1, %34 : vector<8x128xi32>
    %36 = arith.extui %35 : vector<8x128xi1> to vector<8x128xi32>
    %37 = arith.sitofp %36 : vector<8x128xi32> to vector<8x128xf32>
    %38 = arith.addf %32, %37 : vector<8x128xf32>
    %39 = vector.extract_strided_slice %0 {offsets = [0, 6], sizes = [8, 1], strides = [1, 1]} : vector<8x8xi32> to vector<8x1xi32>
    %40 = vector.broadcast %39 : vector<8x1xi32> to vector<8x128xi32>
    %41 = arith.cmpi eq, %1, %40 : vector<8x128xi32>
    %42 = arith.extui %41 : vector<8x128xi1> to vector<8x128xi32>
    %43 = arith.sitofp %42 : vector<8x128xi32> to vector<8x128xf32>
    %44 = arith.addf %38, %43 : vector<8x128xf32>
    %45 = vector.extract_strided_slice %0 {offsets = [0, 7], sizes = [8, 1], strides = [1, 1]} : vector<8x8xi32> to vector<8x1xi32>
    %46 = vector.broadcast %45 : vector<8x1xi32> to vector<8x128xi32>
    %47 = arith.cmpi eq, %1, %46 : vector<8x128xi32>
    %48 = arith.extui %47 : vector<8x128xi1> to vector<8x128xi32>
    %49 = arith.sitofp %48 : vector<8x128xi32> to vector<8x128xf32>
    %50 = arith.addf %44, %49 : vector<8x128xf32>
    %c0_1 = arith.constant 0 : index
    %c0_2 = arith.constant 0 : index
    %51 = vector.load %arg2[%c0_1, %c0_2] : memref<128x128xf32, #tpu.memory_space<vmem>>, vector<128x128xf32>
    %cst_3 = arith.constant dense<0.000000e+00> : vector<8x128xf32>
    %52 = tpu.matmul %50, %51, %cst_3 {dimension_numbers = #tpu.dot_dimension_numbers<[1], [0], [0], [1], [0, 0, 1, 1], [], []>} : vector<8x128xf32>, vector<128x128xf32>, vector<8x128xf32> -> vector<8x128xf32>
    %cst_4 = arith.constant 1.250000e-01 : f32
    %53 = vector.broadcast %cst_4 : f32 to vector<8x128xf32>
    %54 = arith.mulf %52, %53 : vector<8x128xf32>
    %c0_5 = arith.constant 0 : index
    %c0_6 = arith.constant 0 : index
    %55 = vector.load %arg3[%c0_5, %c0_6] : memref<128x128xf32, #tpu.memory_space<vmem>>, vector<128x128xf32>
    %cst_7 = arith.constant dense<0.000000e+00> : vector<8x128xf32>
    %56 = tpu.matmul %54, %55, %cst_7 {dimension_numbers = #tpu.dot_dimension_numbers<[1], [0], [0], [1], [0, 0, 1, 1], [], []>} : vector<8x128xf32>, vector<128x128xf32>, vector<8x128xf32> -> vector<8x128xf32>
    %c0_8 = arith.constant 0 : index
    %c0_9 = arith.constant 0 : index
    %57 = vector.load %arg4[%c0_8, %c0_9] : memref<1x128xf32, #tpu.memory_space<vmem>>, vector<1x128xf32>
    %58 = vector.broadcast %57 : vector<1x128xf32> to vector<8x128xf32>
    %59 = arith.addf %56, %58 : vector<8x128xf32>
    %60 = tpu.iota {dimensions = array<i32: 1>} : vector<8x128xi32>
    %c8_i32 = arith.constant 8 : i32
    %61 = vector.broadcast %c8_i32 : i32 to vector<8x128xi32>
    %62 = arith.cmpi slt, %60, %61 : vector<8x128xi32>
    %cst_10 = arith.constant -1.000000e+30 : f32
    %63 = vector.broadcast %cst_10 : f32 to vector<8x128xf32>
    %64 = arith.select %62, %59, %63 : vector<8x128xi1>, vector<8x128xf32>
    %cst_11 = arith.constant dense<0xFF800000> : vector<8xf32>
    %65 = vector.multi_reduction <maximumf>, %64, %cst_11 [1] : vector<8x128xf32> to vector<8xf32>
    %66 = vector.shape_cast %65 : vector<8xf32> to vector<8x1xf32>
    %67 = vector.broadcast %66 : vector<8x1xf32> to vector<8x128xf32>
    %68 = arith.subf %64, %67 : vector<8x128xf32>
    %69 = math.exp %68 : vector<8x128xf32>
    %cst_12 = arith.constant dense<0.000000e+00> : vector<8xf32>
    %70 = vector.multi_reduction <add>, %69, %cst_12 [1] : vector<8x128xf32> to vector<8xf32>
    %71 = vector.shape_cast %70 : vector<8xf32> to vector<8x1xf32>
    %72 = math.log %71 : vector<8x1xf32>
    %73 = vector.broadcast %72 : vector<8x1xf32> to vector<8x128xf32>
    %74 = arith.subf %68, %73 : vector<8x128xf32>
    %c0_13 = arith.constant 0 : index
    %c0_14 = arith.constant 0 : index
    %75 = vector.load %arg5[%c0_13, %c0_14] : memref<8x128xf32, #tpu.memory_space<vmem>>, vector<8x128xf32>
    tpu.vector_store %arg5[%c0_13, %c0_14], %74 {strides = array<i32>} : memref<8x128xf32, #tpu.memory_space<vmem>>, vector<8x128xf32>,
    return
  }
  func.func @transform_0(%arg0: i32) -> (i32, i32) {
    %c0_i32 = arith.constant 0 : i32
    %c0_i32_0 = arith.constant 0 : i32
    return %arg0, %c0_i32 : i32, i32
  }
  func.func @transform_1(%arg0: i32) -> (i32, i32) {
    %c0_i32 = arith.constant 0 : i32
    %c0_i32_0 = arith.constant 0 : i32
    %c0_i32_1 = arith.constant 0 : i32
    return %c0_i32, %c0_i32_0 : i32, i32
  }
  func.func @transform_2(%arg0: i32) -> (i32, i32) {
    %c0_i32 = arith.constant 0 : i32
    %c0_i32_0 = arith.constant 0 : i32
    %c0_i32_1 = arith.constant 0 : i32
    return %c0_i32, %c0_i32_0 : i32, i32
  }
  func.func @transform_3(%arg0: i32) -> (i32, i32) {
    %c0_i32 = arith.constant 0 : i32
    %c0_i32_0 = arith.constant 0 : i32
    %c0_i32_1 = arith.constant 0 : i32
    return %c0_i32, %c0_i32_0 : i32, i32
  }
  func.func @transform_4(%arg0: i32) -> (i32, i32) {
    %c0_i32 = arith.constant 0 : i32
    %c0_i32_0 = arith.constant 0 : i32
    return %arg0, %c0_i32 : i32, i32
  }
}

</mosaic_0001>

<bundles_post_ra>
// kernel: tpu_custom_call.1
= control target key start
LH: loop header
LB: loop body
LE: loop exit
PB: predicated region body
PF: predicated region fallthrough
CT: control target
= control target key end

     0   :  { %9 = vsyncpa [#allocation3], 0  ;;  %s653_s0 = inlined_call_operand.hbm [shape: s32[8,8], index: 0, kind: input, shape index: {}]   ;;  %s654_s1 = inlined_call_operand.hbm [shape: f32[128,128], index: 1, kind: input, shape index: {}]   ;;  %s655_s2 = inlined_call_operand.hbm [shape: f32[128,128], index: 2, kind: input, shape index: {}]   ;;  %s656_s3 = inlined_call_operand.vmem [shape: f32[1,128], index: 3, kind: input, shape index: {}]   ;;  %s657_s4 = inlined_call_operand.hbm [shape: f32[8,128], index: 4, kind: output, shape index: {}]  }
   0x1   :  { %10 = vsyncpa [#allocation6], 0 }
   0x2   :  { %11 = vsyncpa [#allocation4], 0  ;;  %s553_s15 = smov [#allocation5]  }
   0x3   :  { %s27_s16 = sshll.u32 %s553_s15, 4  ;;  %s28_s16 = int_to_ptr.vmem [resolvable:$true] %s27_s16 }
   0x4   :  { %s475_s17 = scalar_lea.vmem %s28_s16, 2048  ;;  %p480_p1 = scmp.lt.s32.totalorder %s28_s16, %s28_s16 }
   0x5   :  { %p476_p0 = scmp.ne.s32.totalorder %s28_s16, %s475_s17  ;;  %p481_p2 = scmp.lt.s32.totalorder %s475_s17, %s475_s17 }
   0x7   :  { %p482_p3 = por %p481_p2, %p480_p1 }
   0x9   :  { %p483_p4 = pnand %p482_p3, %p476_p0 }
   0xb   :  { %486 = shalt.err (!%p483_p4)
}
   0xc   :  { %s554_s18 = smov 128   ;;  %s555_s19 = smov 8  }
   0xd   :  { %33 = dma.hbm_to_vmem [thread:$0]  %s654_s1, 2048, %s28_s16, [#allocation6], %s554_s18, %s554_s18, %s555_s19  }
   0xe   :  { %s556_s22 = smov [#allocation2]   ;;  %s557_s24 = smov [#allocation7]  }
   0xf   :  { %s18_s23 = sshll.u32 %s556_s22, 4  ;;  %s39_s25 = sshll.u32 %s557_s24, 4  ;;  %s19_s23 = int_to_ptr.vmem [resolvable:$true] %s18_s23  ;;  %s40_s25 = int_to_ptr.vmem [resolvable:$true] %s39_s25 }
  0x10   :  { %s495_s26 = scalar_lea.vmem %s19_s23, 128  ;;  %p500_p6 = scmp.lt.s32.totalorder %s19_s23, %s19_s23 }
  0x11   :  { %p496_p5 = scmp.ne.s32.totalorder %s19_s23, %s495_s26  ;;  %p501_p7 = scmp.lt.s32.totalorder %s495_s26, %s495_s26 }
  0x13   :  { %p502_p8 = por %p501_p7, %p500_p6 }
  0x15   :  { %p503_p9 = pnand %p502_p8, %p496_p5 }
  0x17   :  { %506 = shalt.err (!%p503_p9)
}
  0x18   :  { %21 = dma.hbm_to_vmem [thread:$0]  %s653_s0, 128, %s19_s23, [#allocation3]  }
  0x19   :  { %s515_s29 = scalar_lea.vmem %s40_s25, 2048  ;;  %p520_p11 = scmp.lt.s32.totalorder %s40_s25, %s40_s25 }
  0x1a   :  { %p516_p10 = scmp.ne.s32.totalorder %s40_s25, %s515_s29  ;;  %p521_p12 = scmp.lt.s32.totalorder %s515_s29, %s515_s29 }
  0x1c   :  { %p522_p13 = por %p521_p12, %p520_p11 }
  0x1e   :  { %p523_p0 = pnand %p522_p13, %p516_p10 }
  0x20   :  { %526 = shalt.err (!%p523_p0)
}
  0x21   :  { %45 = dma.hbm_to_vmem [thread:$0]  %s655_s2, 2048, %s40_s25, [#allocation6], %s554_s18, %s554_s18, %s555_s19  }
  0x22   :  { %547 = dma.done.wait [#allocation3], 128  }
  0x23   :  { %548 = vsyncadd [#allocation3], 4294967168 }
  0x24   :  { %549 = dma.done.wait [#allocation6], 4096  }
  0x25   :  { %550 = vsyncadd [#allocation6], 4294963200  ;;  %v558_v0 = vmov 2   ;;  %v559_v1 = vmov 0   ;;  %v560_v2 = vmov 0.0   ;;  %v57_v3 = vld [vmem:[#allocation2] sm:$0xff]  ;;  %v58_v40 = vlaneseq }
  0x26   :  { %456 = vset.pattern.permute.xlu1 %v558_v0  ;;  %454 = vset.pattern.permute.xlu0 %v559_v1  ;;  %v131_v4 = vld [vmem:[#allocation5 + $0x78] sm:$0xff]  ;;  %v130_v5 = vld [vmem:[#allocation5 + $0x70] sm:$0xff]  ;;  %v561_v6 = vmov 3   ;;  %v562_v7 = vmov 1   ;;  %v129_v8 = vld [vmem:[#allocation5 + $0x68] sm:$0xff]  ;;  %v563_v10 = vmov 4  }
  0x27   :  { %368 = vmatprep.subr.mxu0 %v560_v2  ;;  %403 = vmatprep.subr.mxu1 %v560_v2  ;;  %v128_v9 = vld [vmem:[#allocation5 + $0x60] sm:$0xff]  ;;  %v564_v11 = vmov 5   ;;  %v127_v12 = vld [vmem:[#allocation5 + $0x58] sm:$0xff]  ;;  %v126_v13 = vld [vmem:[#allocation5 + $0x50] sm:$0xff]  ;;  %v565_v14 = vmov 6   ;;  %v566_v17 = vmov 7  }
  0x28   :  { %75 = vperm.xlu1 %456, %v57_v3   ;;  %61 = vperm.xlu0 %454, %v57_v3   ;;  %v125_v15 = vld [vmem:[#allocation5 + $0x48] sm:$0xff]  ;;  %v124_v16 = vld [vmem:[#allocation5 + $0x40] sm:$0xff]  ;;  %v123_v18 = vld [vmem:[#allocation5 + $0x38] sm:$0xff]  ;;  %vm567_vm0 = vmmov 0   ;;  %v59_v43 = vand.u32 127, %v58_v40  ;;  %s568_s5 = smov [#allocation8]  }
  0x29   :  { %369 = vmatpush3.msra.mxu0 %v131_v4  ;;  %v122_v19 = vld [vmem:[#allocation5 + $0x30] sm:$0xff]  ;;  %v218_v20 = vld [vmem:[#allocation7 + $0x78] sm:$0xff]  ;;  %400 = vmatprep.mubr.msk.f32.mxu0 %vm567_vm0, %v560_v2  ;;  %v121_v22 = vld [vmem:[#allocation5 + $0x28] sm:$0xff]  ;;  %s315_s6 = sshll.u32 %s568_s5, 4  ;;  %s316_s6 = int_to_ptr.vmem [resolvable:$true] %s315_s6 }
  0x2a   :  { %370 = vmatprep.subr.mxu0 %v560_v2  ;;  %v217_v21 = vld [vmem:[#allocation7 + $0x70] sm:$0xff]  ;;  %404 = vmatpush3.msra.mxu1 %v218_v20  ;;  %v216_v23 = vld [vmem:[#allocation7 + $0x68] sm:$0xff]  ;;  %v120_v24 = vld [vmem:[#allocation5 + $0x20] sm:$0xff]  ;;  %vm296_vm9 = vcmp.lt.s32.totalorder %v59_v43, 8  ;;  %p532_p2 = scmp.lt.s32.totalorder %s316_s6, %s316_s6 }
  0x2b   :  { %371 = vmatpush3.msra.mxu0 %v130_v5  ;;  %405 = vmatprep.subr.mxu1 %v560_v2  ;;  %v215_v25 = vld [vmem:[#allocation7 + $0x60] sm:$0xff]  ;;  %v119_v26 = vld [vmem:[#allocation5 + $0x18] sm:$0xff]  ;;  %v118_v28 = vld [vmem:[#allocation5 + $0x10] sm:$0xff] }
  0x2c   :  { %457 = vset.pattern.permute.xlu1 %v561_v6  ;;  %455 = vset.pattern.permute.xlu0 %v562_v7  ;;  %v214_v27 = vld [vmem:[#allocation7 + $0x58] sm:$0xff]  ;;  %v213_v29 = vld [vmem:[#allocation7 + $0x50] sm:$0xff]  ;;  %v117_v30 = vld [vmem:[#allocation5 + $0x8] sm:$0xff] }
  0x2d   :  { %82 = vperm.xlu1 %457, %v57_v3   ;;  %68 = vperm.xlu0 %455, %v57_v3   ;;  %v212_v31 = vld [vmem:[#allocation7 + $0x48] sm:$0xff]  ;;  %v116_v32 = vld [vmem:[#allocation5] sm:$0xff]  ;;  %v210_v34 = vld [vmem:[#allocation7 + $0x38] sm:$0xff] }
  0x2e   :  { %372 = vmatprep.subr.mxu0 %v560_v2  ;;  %406 = vmatpush3.msra.mxu1 %v217_v21  ;;  %v211_v33 = vld [vmem:[#allocation7 + $0x40] sm:$0xff]  ;;  %v209_v35 = vld [vmem:[#allocation7 + $0x30] sm:$0xff]  ;;  %v208_v36 = vld [vmem:[#allocation7 + $0x28] sm:$0xff] }
  0x2f   :  { %373 = vmatpush3.msra.mxu0 %v129_v8  ;;  %407 = vmatprep.subr.mxu1 %v560_v2  ;;  %v207_v37 = vld [vmem:[#allocation7 + $0x20] sm:$0xff]  ;;  %v206_v38 = vld [vmem:[#allocation7 + $0x18] sm:$0xff]  ;;  %v205_v39 = vld [vmem:[#allocation7 + $0x10] sm:$0xff] }
  0x30   :  { %374 = vmatprep.subr.mxu0 %v560_v2  ;;  %408 = vmatpush3.msra.mxu1 %v216_v23  ;;  %v204_v1 = vld [vmem:[#allocation7 + $0x8] sm:$0xff]  ;;  %v333_v7 = vld [vmem:[%s656_s3] ss:$0 sm:$0xff]  ;;  %s527_s3 = scalar_lea.vmem %s316_s6, 128 }
  0x31   :  { %458 = vset.pattern.permute.xlu1 %v563_v10  ;;  %459 = vset.pattern.permute.xlu0 %v564_v11  ;;  %p528_p1 = scmp.ne.s32.totalorder %s316_s6, %s527_s3  ;;  %p533_p3 = scmp.lt.s32.totalorder %s527_s3, %s527_s3 }
  0x32   :  { %89 = vperm.xlu1 %458, %v57_v3   ;;  %96 = vperm.xlu0 %459, %v57_v3  }
  0x33   :  { %375 = vmatpush3.msra.mxu0 %v128_v9  ;;  %409 = vmatprep.subr.mxu1 %v560_v2  ;;  %p534_p4 = por %p533_p3, %p532_p2 }
  0x34   :  { %376 = vmatprep.subr.mxu0 %v560_v2  ;;  %410 = vmatpush3.msra.mxu1 %v215_v25 }
  0x35   :  { %377 = vmatpush3.msra.mxu0 %v127_v12  ;;  %411 = vmatprep.subr.mxu1 %v560_v2  ;;  %p535_p5 = pnand %p534_p4, %p528_p1 }
  0x36   :  { %460 = vset.pattern.permute.xlu1 %v565_v14  ;;  %378 = vmatprep.subr.mxu0 %v560_v2 }
  0x37   :  { %103 = vperm.xlu1 %460, %v57_v3   ;;  %379 = vmatpush3.msra.mxu0 %v126_v13 }
  0x38   :  { %380 = vmatprep.subr.mxu0 %v560_v2  ;;  %462 = vset.pattern.permute.xlu0 %v566_v17 }
  0x39   :  { %381 = vmatpush3.msra.mxu0 %v125_v15  ;;  %412 = vmatpush3.msra.mxu1 %v214_v27 }
  0x3a   :  { %382 = vmatprep.subr.mxu0 %v560_v2  ;;  %413 = vmatprep.subr.mxu1 %v560_v2 }
  0x3b   :  { %461 = vset.pattern.permute.xlu1 %v566_v17  ;;  %383 = vmatpush3.msra.mxu0 %v124_v16 }
  0x3c   :  { %110 = vperm.xlu1 %461, %v57_v3   ;;  %384 = vmatprep.subr.mxu0 %v560_v2  ;;  %v203_v3 = vld [vmem:[#allocation7] sm:$0xff] }
  0x3d   :  { %385 = vmatpush3.msra.mxu0 %v123_v18  ;;  %414 = vmatpush3.msra.mxu1 %v213_v29 }
  0x3e   :  { %386 = vmatprep.subr.mxu0 %v560_v2  ;;  %415 = vmatprep.subr.mxu1 %v560_v2 }
  0x3f   :  { %387 = vmatpush3.msra.mxu0 %v122_v19  ;;  %416 = vmatpush3.msra.mxu1 %v212_v31 }
  0x40   :  { %388 = vmatprep.subr.mxu0 %v560_v2  ;;  %417 = vmatprep.subr.mxu1 %v560_v2 }
  0x41   :  { %389 = vmatpush3.msra.mxu0 %v121_v22  ;;  %418 = vmatpush3.msra.mxu1 %v211_v33 }
  0x42   :  { %390 = vmatprep.subr.mxu0 %v560_v2  ;;  %435 = vmatprep.mubr.msk.f32.mxu1 %vm567_vm0, %v560_v2 }
  0x43   :  { %391 = vmatpush3.msra.mxu0 %v120_v24  ;;  %419 = vmatprep.subr.mxu1 %v560_v2 }
  0x44   :  { %392 = vmatprep.subr.mxu0 %v560_v2  ;;  %420 = vmatpush3.msra.mxu1 %v210_v34 }
  0x45   :  { %393 = vmatpush3.msra.mxu0 %v119_v26  ;;  %421 = vmatprep.subr.mxu1 %v560_v2 }
  0x46   :  { %394 = vmatprep.subr.mxu0 %v560_v2  ;;  %422 = vmatpush3.msra.mxu1 %v209_v35 }
  0x47   :  { %395 = vmatpush3.msra.mxu0 %v118_v28  ;;  %423 = vmatprep.subr.mxu1 %v560_v2 }
  0x48   :  { %396 = vmatprep.subr.mxu0 %v560_v2  ;;  %424 = vmatpush3.msra.mxu1 %v208_v36 }
  0x49   :  { %397 = vmatpush3.msra.mxu0 %v117_v30  ;;  %425 = vmatprep.subr.mxu1 %v560_v2 }
  0x4a   :  { %398 = vmatprep.subr.mxu0 %v560_v2  ;;  %426 = vmatpush3.msra.mxu1 %v207_v37 }
  0x4b   :  { %399 = vmatpush3.msra.mxu0 %v116_v32  ;;  %427 = vmatprep.subr.mxu1 %v560_v2 }
  0x4c   :  { %428 = vmatpush3.msra.mxu1 %v206_v38 }
  0x4d   :  { %429 = vmatprep.subr.mxu1 %v560_v2 }
  0x4e   :  { %430 = vmatpush3.msra.mxu1 %v205_v39 }
  0x4f   :  { %431 = vmatprep.subr.mxu1 %v560_v2 }
  0x50   :  { %432 = vmatpush3.msra.mxu1 %v204_v1 }
  0x51   :  { %433 = vmatprep.subr.mxu1 %v560_v2 }
  0x52   :  { %434 = vmatpush3.msra.mxu1 %v203_v3 }
  0xa3   :  { %v76_v41 = vpop.permute.xlu1 %75  ;;  %v62_v42 = vpop.permute.xlu0 %61 }
  0xa4   :  { %vm63_vm1 = vcmp.eq.s32.totalorder %v59_v43, %v62_v42  ;;  %vm77_vm2 = vcmp.eq.s32.totalorder %v59_v43, %v76_v41 }
  0xa5   :  { %v325_v46 = vsel %vm63_vm1, 1.0, %v560_v2  ;;  %v327_v49 = vsel %vm77_vm2, 1.0, %v560_v2 }
  0xa8   :  { %v83_v44 = vpop.permute.xlu1 %82  ;;  %v69_v45 = vpop.permute.xlu0 %68 }
  0xa9   :  { %vm70_vm3 = vcmp.eq.s32.totalorder %v59_v43, %v69_v45  ;;  %vm84_vm4 = vcmp.eq.s32.totalorder %v59_v43, %v83_v44 }
  0xaa   :  { %v326_v47 = vsel %vm70_vm3, 1.0, %v560_v2  ;;  %v328_v53 = vsel %vm84_vm4, 1.0, %v560_v2 }
  0xab   :  { %v73_v48 = vadd.f32 %v326_v47, %v325_v46 }
  0xad   :  { %v80_v50 = vadd.f32 %v327_v49, %v73_v48  ;;  %v90_v51 = vpop.permute.xlu1 %89  ;;  %v97_v52 = vpop.permute.xlu0 %96 }
  0xae   :  { %vm91_vm5 = vcmp.eq.s32.totalorder %v59_v43, %v90_v51  ;;  %vm98_vm6 = vcmp.eq.s32.totalorder %v59_v43, %v97_v52 }
  0xaf   :  { %v87_v54 = vadd.f32 %v328_v53, %v80_v50  ;;  %v329_v55 = vsel %vm91_vm5, 1.0, %v560_v2  ;;  %v330_v57 = vsel %vm98_vm6, 1.0, %v560_v2 }
  0xb1   :  { %v94_v56 = vadd.f32 %v329_v55, %v87_v54 }
  0xb2   :  { %v104_v58 = vpop.permute.xlu1 %103 }
  0xb3   :  { %vm105_vm7 = vcmp.eq.s32.totalorder %v59_v43, %v104_v58  ;;  %v101_v59 = vadd.f32 %v330_v57, %v94_v56 }
  0xb4   :  { %v331_v60 = vsel %vm105_vm7, 1.0, %v560_v2 }
  0xb5   :  { %v108_v62 = vadd.f32 %v331_v60, %v101_v59 }
  0xb7   :  { %v111_v61 = vpop.permute.xlu1 %110 }
  0xb8   :  { %vm112_vm8 = vcmp.eq.s32.totalorder %v59_v43, %v111_v61 }
  0xb9   :  { %v332_v63 = vsel %vm112_vm8, 1.0, %v560_v2 }
  0xba   :  { %v115_v0 = vadd.f32 %v332_v63, %v108_v62 }
  0xbc   :  { %401 = vmatmul.mubr.f32.vlgmr.msra.gmra.mxu0 %v115_v0 }
 0x17c   :  { %v198_v4 = vpop.f32.mrf.mxu0 }
 0x17d   :  { %v202_v5 = vmul.f32 0.125, %v198_v4 }
 0x17e   :  { %v402_v6 = vpop.f32.mrf.mxu0 }
 0x17f   :  { %436 = vmatmul.mubr.f32.vlgmr.msra.gmra.mxu1 %v202_v5 }
 0x23f   :  { %v292_v8 = vpop.f32.mrf.mxu1 }
 0x240   :  { %v293_v9 = vadd.f32 %v333_v7, %v292_v8 }
 0x241   :  { %v437_v10 = vpop.f32.mrf.mxu1 }
 0x242   :  { %v297_v11 = vsel %vm296_vm9, %v293_v9, -1e+30 }
 0x243   :  { %298 = vmax.xlane.f32.xlu0 %v297_v11 }
 0x2cc   :  { %v299_v12 = vpop.xlane.xlu0 %298 }
 0x2cd   :  { %v300_v13 = vsub.f32 %v297_v11, %v299_v12 }
 0x2cf   :  { %v301_v14 = vmul.f32 1.442695, %v300_v13 }
 0x2d1   :  { %463 = vpow2.f32 %v301_v14 }
 0x2de   :  { %v464_v2 = vpop.eup %463 }
 0x2df   :  { %303 = vadd.xlane.f32.xlu1 %v464_v2 }
 0x368   :  { %v304_v15 = vpop.xlane.xlu1 %303 }
 0x369   :  { %465 = vlog2.f32 %v304_v15 }
 0x376   :  { %v466_v16 = vpop.eup %465 }
 0x377   :  { %v306_v17 = vmul.f32 0.6931472, %v466_v16 }
 0x379   :  { %v307_v18 = vsub.f32 %v300_v13, %v306_v17 }
 0x37b   :  { %308 = vst [vmem:[#allocation8] sm:$0xff] %v307_v18 }
 0x37c   :  { %538 = shalt.err (!%p535_p5)
}
 0x37d   :  { %318 = dma.vmem_to_hbm [thread:$0]  %s316_s6, 128, %s657_s4, [#allocation4]  }
 0x37e   :  { %551 = dma.done.wait [#allocation4], 128  }
 0x37f   :  { %552 = vsyncadd [#allocation4], 4294967168 }
 0x380   :  { %322 = vsyncpa [#allocation3], 1 }
 0x381   :  { %323 = vsyncpa [#allocation6], 1 }
 0x382   :  { %324 = vsyncpa [#allocation4], 1 }

</bundles_post_ra>
